<compile_context>
chip_gen: v7x
topology: tpu7x:2x2x1
jax: 0.10.0
libtpu: 0.0.40
codegen_flags: <defaults>
</compile_context>

<pallas_src>
import jax
import jax.numpy as jnp
from jax.experimental import pallas as pl
from jax.experimental.pallas import tpu as pltpu


# ----------------------------------------------------------------------------
# Scaled-down, module-consistent constants (originals: window=2048, step=256,
# n_samples=2**17, hidden_channels=256; here window=128, step=32, n_samples=1024
# so n_frames = 32 and n_bins = window//2 = 64).
# ----------------------------------------------------------------------------
TRANSFORM_WINDOW_SIZE = 128
TRANSFORM_STEP_SIZE = 32
N_SAMPLES = 1024
N_FRAMES = N_SAMPLES // TRANSFORM_STEP_SIZE        # 32
N_BINS = TRANSFORM_WINDOW_SIZE // 2                # 64  (n_coeffs - 1)
CONTEXT_DIM = 32                                   # matches the module
HIDDEN_CHANNELS = 64                               # scaled down from 256
BATCH = 2
HEADS_PAD = 128                                    # merged-head N padded to a full lane width

_RATIO = TRANSFORM_WINDOW_SIZE // TRANSFORM_STEP_SIZE            # 4 step-chunks / frame
# padded row count: last frame needs rows [N_FRAMES-1 .. N_FRAMES-1+_RATIO-1];
# round up to a multiple of 8 for friendly sublane tiling.
_MIN_ROWS = N_FRAMES + _RATIO - 1                                # 35
_N_ROWS = ((_MIN_ROWS + 7) // 8) * 8                             # 40
_PADDED_SAMPLES = _N_ROWS * TRANSFORM_STEP_SIZE                  # 1280


# ----------------------------------------------------------------------------
# Fused per-batch kernel: shifted-chunk |DFT| -> encoder proj -> merged heads
# -> relu/mask/top-1 sparsify -> (spec^T, packed [event vector | scheduling]).
# ----------------------------------------------------------------------------
def _fused_encode_kernel(audio_ref, basis_ref, encw_ref, wall_ref, ball_ref,
                         spec_ref, packed_ref):
    nf, nb, c, ss = N_FRAMES, N_BINS, CONTEXT_DIM, TRANSFORM_STEP_SIZE

    # ---- STFT magnitude via shifted-chunk matmul accumulation ---------------
    # frame f = audio rows f .. f+_RATIO-1 concatenated; instead of building
    # that slab, accumulate z += rows[i:i+T] @ basis[i*step:(i+1)*step].
    # bf16 operands, f32 accumulation on the MXU.
    z = jnp.zeros((nf, 2 * nb), jnp.float32)
    for i in range(_RATIO):                                   # static unroll (4)
        chunk = audio_ref[i:i + nf, :].astype(jnp.bfloat16)   # (T, step)
        z = z + jnp.dot(chunk, basis_ref[i * ss:(i + 1) * ss, :],
                        preferred_element_type=jnp.float32)
    z2 = z * z
    mag = jnp.sqrt(z2[:, :nb] + z2[:, nb:])                   # (T, NB) f32

    # spectrogram stored already permuted to (NB, T): no post-kernel transpose
    spec_ref[...] = mag.T

    # ---- placeholder encoder: 1x1 channel projection ------------------------
    enc = jnp.dot(mag, encw_ref[...], preferred_element_type=jnp.float32)   # (T, H)

    # ---- merged to_event_vectors + to_event_switch (N padded to 128) --------
    heads = (jnp.dot(enc, wall_ref[...], preferred_element_type=jnp.float32)
             + ball_ref[...])                                 # (T, 128)
    ev = heads[:, :c]                                         # (T, C)
    sw = heads[:, c:c + 1]                                    # (T, 1)

    # ---- relu + second-half mask + top-1 sparsify (f32 VPU epilogue) --------
    row_iota = jax.lax.broadcasted_iota(jnp.int32, (nf, 1), 0)    # (T, 1)
    half = nf // 2
    attn = jnp.maximum(sw, 0.0) * (row_iota < half).astype(jnp.float32)

    # top-1 (n_events == 1 inside encode); first index wins ties.
    # NOTE: if attn is identically zero this degenerates to frame 0 with value
    # 0 (harmless: scheduling stays all-zero, vec picks frame 0).
    mx = jnp.max(attn, axis=0, keepdims=True)                     # (1, 1)
    idx = jnp.min(jnp.where(attn == mx, row_iota, nf),
                  axis=0, keepdims=True)                          # (1, 1) int32
    onehot = (row_iota == idx).astype(jnp.float32)                # (T, 1)

    # sparsify_vectors: event vector at the attended frame
    vec_row = jnp.sum(ev * onehot, axis=0, keepdims=True)         # (1, C)
    # scheduling[b, 0, idx] = attn[idx] (== mx); zero elsewhere
    lane_iota = jax.lax.broadcasted_iota(jnp.int32, (1, nf), 1)   # (1, T)
    sched_row = jnp.where(lane_iota == idx, mx, 0.0)              # (1, T)

    # one lane-contiguous store instead of two narrow masked stores
    packed_ref[...] = jnp.concatenate([vec_row, sched_row], axis=-1)   # (1, C+T)


@jax.jit
def model_encode(audio, params):
    """audio: (B, 1, N_SAMPLES) -> (spec (B,NB,T), vecs (B,1,C), sched (B,1,T))."""
    b = audio.shape[0]
    ws, ss, nf, nb, c, h = (TRANSFORM_WINDOW_SIZE, TRANSFORM_STEP_SIZE,
                            N_FRAMES, N_BINS, CONTEXT_DIM, HIDDEN_CHANNELS)

    # glue: zero-pad the tail (stft pad=True) + reshape into step-size rows.
    # NOTE: last dim = step = 32 lanes is a scaled-size artifact; at the real
    # step=256 the audio rows are already lane-dense.
    x = audio[:, 0, :]
    x = jnp.pad(x, ((0, 0), (0, _PADDED_SAMPLES - x.shape[-1])))
    audio3d = x.reshape(b, _N_ROWS, ss)

    # constants: Hann-windowed real-DFT basis, cos|sin concatenated -> (W, 2*NB),
    # stored bf16 (halves VMEM at real sizes, native MXU rate; accumulate f32).
    n = jnp.arange(ws, dtype=jnp.float32)
    win = 0.5 - 0.5 * jnp.cos(2.0 * jnp.pi * n / ws)
    k = jnp.arange(nb, dtype=jnp.float32)
    ang = 2.0 * jnp.pi * n[:, None] * k[None, :] / ws
    basis = (jnp.concatenate([jnp.cos(ang), jnp.sin(ang)], axis=-1)
             * win[:, None]).astype(jnp.bfloat16)

    # merged 1x1-conv heads: weights (H, C+1) zero-padded to (H, 128) lanes.
    w_all = jnp.concatenate([params["w_vec"], params["w_sw"]], axis=0).T   # (H, C+1)
    b_all = jnp.concatenate([params["b_vec"], params["b_sw"]], axis=0).T   # (1, C+1)
    w_all = jnp.pad(w_all, ((0, 0), (0, HEADS_PAD - (c + 1))))
    b_all = jnp.pad(b_all, ((0, 0), (0, HEADS_PAD - (c + 1))))
    encw = params["enc_proj"].T                                            # (NB, H)

    # advisory cost estimate so XLA can overlap the custom call
    flops = b * (2 * nf * ws * 2 * nb + 2 * nf * nb * h + 2 * nf * h * HEADS_PAD)
    transcendentals = b * nf * nb                     # sqrt in the magnitude
    bytes_accessed = (b * _N_ROWS * ss * 4 + ws * 2 * nb * 2 + nb * h * 4
                      + h * HEADS_PAD * 4 + HEADS_PAD * 4
                      + b * nb * nf * 4 + b * (c + nf) * 4)

    spec, packed = pl.pallas_call(
        _fused_encode_kernel,
        out_shape=(
            jax.ShapeDtypeStruct((b, nb, nf), jnp.float32),        # spec, (B, NB, T)
            jax.ShapeDtypeStruct((b, 1, c + nf), jnp.float32),     # [vec | sched]
        ),
        grid=(b,),
        in_specs=[
            pl.BlockSpec((None, _N_ROWS, ss), lambda i: (i, 0, 0)),
            # grid-invariant constants (same block every step -> no re-DMA
            # between consecutive steps; at real sizes also single-buffer via
            # pipeline_mode=pl.Buffered(1))
            pl.BlockSpec((ws, 2 * nb), lambda i: (0, 0)),
            pl.BlockSpec((nb, h), lambda i: (0, 0)),
            pl.BlockSpec((h, HEADS_PAD), lambda i: (0, 0)),
            pl.BlockSpec((1, HEADS_PAD), lambda i: (0, 0)),
        ],
        out_specs=(
            pl.BlockSpec((None, nb, nf), lambda i: (i, 0, 0)),
            pl.BlockSpec((None, 1, c + nf), lambda i: (i, 0, 0)),
        ),
        compiler_params=pltpu.CompilerParams(
            dimension_semantics=("parallel",),       # batch across TCs (v7x megacore)
            vmem_limit_bytes=32 * 1024 * 1024),      # re-derive at real sizes per gen
        cost_estimate=pl.CostEstimate(flops=flops,
                                      transcendentals=transcendentals,
                                      bytes_accessed=bytes_accessed),
    )(audio3d, basis, encw, w_all, b_all)

    vecs = packed[:, :, :c]                           # (B, 1, C)
    sched = packed[:, :, c:]                          # (B, 1, T)
    return spec, vecs, sched


# ----------------------------------------------------------------------------
# Parameter init (deterministic, std=0.02 like make_initializer(0.02)).
# ----------------------------------------------------------------------------
def init_params(key):
    k1, k2, k3 = jax.random.split(key, 3)
    return {
        # TODO(synk): placeholder 1x1 projection standing in for AntiCausalAnalysis.
        "enc_proj": jax.random.normal(k1, (HIDDEN_CHANNELS, N_BINS), jnp.float32) * 0.02,
        "w_vec": jax.random.normal(k2, (CONTEXT_DIM, HIDDEN_CHANNELS), jnp.float32) * 0.02,
        "b_vec": jnp.zeros((CONTEXT_DIM, 1), jnp.float32),
        "w_sw": jax.random.normal(k3, (1, HIDDEN_CHANNELS), jnp.float32) * 0.02,
        "b_sw": jnp.zeros((1, 1), jnp.float32) + 0.01,
    }


# ----------------------------------------------------------------------------
if __name__ == "__main__":
    key = jax.random.PRNGKey(0)
    ka, kp = jax.random.split(key)
    audio = jax.random.normal(ka, (BATCH, 1, N_SAMPLES), jnp.float32)
    params = init_params(kp)

    spec, vecs, sched = model_encode(audio, params)
    jax.block_until_ready((spec, vecs, sched))

    # shapes
    assert spec.shape == (BATCH, N_BINS, N_FRAMES)
    assert vecs.shape == (BATCH, 1, CONTEXT_DIM)
    assert sched.shape == (BATCH, 1, N_FRAMES)

    # verify the STFT-magnitude path against a jnp.fft reference (loose tol:
    # bf16 MXU operands with f32 accumulation)
    x = jnp.pad(audio[:, 0, :],
                ((0, 0), (0, TRANSFORM_WINDOW_SIZE - TRANSFORM_STEP_SIZE)))
    idx = (jnp.arange(N_FRAMES)[:, None] * TRANSFORM_STEP_SIZE
           + jnp.arange(TRANSFORM_WINDOW_SIZE)[None, :])
    frames = x[:, idx]
    n = jnp.arange(TRANSFORM_WINDOW_SIZE, dtype=jnp.float32)
    win = 0.5 - 0.5 * jnp.cos(2.0 * jnp.pi * n / TRANSFORM_WINDOW_SIZE)
    ref = jnp.abs(jnp.fft.rfft(frames * win, axis=-1))[..., :N_BINS]
    ref = jnp.transpose(ref, (0, 2, 1))
    assert jnp.allclose(spec, ref, rtol=5e-2, atol=1e-1), "STFT kernel mismatch"

    # scheduling: zero in the second half of the frames, at most one nonzero
    # time step per event (top-1 sparsify)
    assert int(jnp.sum(sched[..., N_FRAMES // 2:] != 0)) == 0
    assert int(jnp.max(jnp.sum((sched != 0).astype(jnp.int32), axis=-1))) <= 1

    print("KERNEL_OK")
</pallas_src>

<mosaic_0001>
module attributes {stable_mosaic.version = 11 : i64} {
  func.func @_fused_encode_kernel(%arg0: i32, %arg1: memref<1x40x32xf32, #tpu.memory_space<vmem>>, %arg2: memref<128x128xbf16, #tpu.memory_space<vmem>>, %arg3: memref<64x64xf32, #tpu.memory_space<vmem>>, %arg4: memref<64x128xf32, #tpu.memory_space<vmem>>, %arg5: memref<1x128xf32, #tpu.memory_space<vmem>>, %arg6: memref<1x64x32xf32, #tpu.memory_space<vmem>>, %arg7: memref<1x1x64xf32, #tpu.memory_space<vmem>>) attributes {dimension_semantics = [#tpu.dimension_semantics<parallel>], iteration_bounds = array<i64: 2>, scalar_prefetch = 0 : i64, scratch_operands = 0 : i64, tpu.core_type = #tpu.core_type<tc>, window_params = [{transform_indices = @transform_0, window_bounds = array<i64: 1, 40, 32>}, {pipeline_mode = #tpu.pipeline_mode<synchronous>, transform_indices = @transform_1, window_bounds = array<i64: 128, 128>}, {pipeline_mode = #tpu.pipeline_mode<synchronous>, transform_indices = @transform_2, window_bounds = array<i64: 64, 64>}, {pipeline_mode = #tpu.pipeline_mode<synchronous>, transform_indices = @transform_3, window_bounds = array<i64: 64, 128>}, {pipeline_mode = #tpu.pipeline_mode<synchronous>, transform_indices = @transform_4, window_bounds = array<i64: 1, 128>}, {transform_indices = @transform_5, window_bounds = array<i64: 1, 64, 32>}, {transform_indices = @transform_6, window_bounds = array<i64: 1, 1, 64>}]} {
    %cst = arith.constant 0.000000e+00 : f32
    %0 = vector.broadcast %cst : f32 to vector<32x128xf32>
    %c0 = arith.constant 0 : index
    %c0_0 = arith.constant 0 : index
    %c0_1 = arith.constant 0 : index
    %1 = vector.load %arg1[%c0, %c0_0, %c0_1] : memref<1x40x32xf32, #tpu.memory_space<vmem>>, vector<1x32x32xf32>
    %2 = vector.shape_cast %1 : vector<1x32x32xf32> to vector<32x32xf32>
    %3 = arith.truncf %2 : vector<32x32xf32> to vector<32x32xbf16>
    %c0_2 = arith.constant 0 : index
    %c0_3 = arith.constant 0 : index
    %4 = vector.load %arg2[%c0_2, %c0_3] : memref<128x128xbf16, #tpu.memory_space<vmem>>, vector<32x128xbf16>
    %cst_4 = arith.constant dense<0.000000e+00> : vector<32x128xf32>
    %5 = tpu.matmul %3, %4, %cst_4 {dimension_numbers = #tpu.dot_dimension_numbers<[1], [0], [0], [1], [0, 0, 1, 1], [], []>} : vector<32x32xbf16>, vector<32x128xbf16>, vector<32x128xf32> -> vector<32x128xf32>
    %6 = arith.addf %0, %5 : vector<32x128xf32>
    %c0_5 = arith.constant 0 : index
    %c1 = arith.constant 1 : index
    %c0_6 = arith.constant 0 : index
    %7 = vector.load %arg1[%c0_5, %c1, %c0_6] : memref<1x40x32xf32, #tpu.memory_space<vmem>>, vector<1x32x32xf32>
    %8 = vector.shape_cast %7 : vector<1x32x32xf32> to vector<32x32xf32>
    %9 = arith.truncf %8 : vector<32x32xf32> to vector<32x32xbf16>
    %c32 = arith.constant 32 : index
    %c0_7 = arith.constant 0 : index
    %10 = vector.load %arg2[%c32, %c0_7] : memref<128x128xbf16, #tpu.memory_space<vmem>>, vector<32x128xbf16>
    %cst_8 = arith.constant dense<0.000000e+00> : vector<32x128xf32>
    %11 = tpu.matmul %9, %10, %cst_8 {dimension_numbers = #tpu.dot_dimension_numbers<[1], [0], [0], [1], [0, 0, 1, 1], [], []>} : vector<32x32xbf16>, vector<32x128xbf16>, vector<32x128xf32> -> vector<32x128xf32>
    %12 = arith.addf %6, %11 : vector<32x128xf32>
    %c0_9 = arith.constant 0 : index
    %c2 = arith.constant 2 : index
    %c0_10 = arith.constant 0 : index
    %13 = vector.load %arg1[%c0_9, %c2, %c0_10] : memref<1x40x32xf32, #tpu.memory_space<vmem>>, vector<1x32x32xf32>
    %14 = vector.shape_cast %13 : vector<1x32x32xf32> to vector<32x32xf32>
    %15 = arith.truncf %14 : vector<32x32xf32> to vector<32x32xbf16>
    %c64 = arith.constant 64 : index
    %c0_11 = arith.constant 0 : index
    %16 = vector.load %arg2[%c64, %c0_11] : memref<128x128xbf16, #tpu.memory_space<vmem>>, vector<32x128xbf16>
    %cst_12 = arith.constant dense<0.000000e+00> : vector<32x128xf32>
    %17 = tpu.matmul %15, %16, %cst_12 {dimension_numbers = #tpu.dot_dimension_numbers<[1], [0], [0], [1], [0, 0, 1, 1], [], []>} : vector<32x32xbf16>, vector<32x128xbf16>, vector<32x128xf32> -> vector<32x128xf32>
    %18 = arith.addf %12, %17 : vector<32x128xf32>
    %c0_13 = arith.constant 0 : index
    %c3 = arith.constant 3 : index
    %c0_14 = arith.constant 0 : index
    %19 = vector.load %arg1[%c0_13, %c3, %c0_14] : memref<1x40x32xf32, #tpu.memory_space<vmem>>, vector<1x32x32xf32>
    %20 = vector.shape_cast %19 : vector<1x32x32xf32> to vector<32x32xf32>
    %21 = arith.truncf %20 : vector<32x32xf32> to vector<32x32xbf16>
    %c96 = arith.constant 96 : index
    %c0_15 = arith.constant 0 : index
    %22 = vector.load %arg2[%c96, %c0_15] : memref<128x128xbf16, #tpu.memory_space<vmem>>, vector<32x128xbf16>
    %cst_16 = arith.constant dense<0.000000e+00> : vector<32x128xf32>
    %23 = tpu.matmul %21, %22, %cst_16 {dimension_numbers = #tpu.dot_dimension_numbers<[1], [0], [0], [1], [0, 0, 1, 1], [], []>} : vector<32x32xbf16>, vector<32x128xbf16>, vector<32x128xf32> -> vector<32x128xf32>
    %24 = arith.addf %18, %23 : vector<32x128xf32>
    %25 = arith.mulf %24, %24 : vector<32x128xf32>
    %26 = vector.extract_strided_slice %25 {offsets = [0, 0], sizes = [32, 64], strides = [1, 1]} : vector<32x128xf32> to vector<32x64xf32>
    %27 = vector.extract_strided_slice %25 {offsets = [0, 64], sizes = [32, 64], strides = [1, 1]} : vector<32x128xf32> to vector<32x64xf32>
    %28 = arith.addf %26, %27 : vector<32x64xf32>
    %29 = math.sqrt %28 : vector<32x64xf32>
    %30 = tpu.transpose %29, [1, 0] : vector<32x64xf32> -> vector<64x32xf32>
    %c0_17 = arith.constant 0 : index
    %c0_18 = arith.constant 0 : index
    %c0_19 = arith.constant 0 : index
    %31 = vector.load %arg6[%c0_17, %c0_18, %c0_19] : memref<1x64x32xf32, #tpu.memory_space<vmem>>, vector<1x64x32xf32>
    %32 = vector.shape_cast %31 : vector<1x64x32xf32> to vector<64x32xf32>
    %33 = vector.shape_cast %30 : vector<64x32xf32> to vector<1x64x32xf32>
    tpu.vector_store %arg6[%c0_17, %c0_18, %c0_19], %33 {strides = array<i32>} : memref<1x64x32xf32, #tpu.memory_space<vmem>>, vector<1x64x32xf32>,
    %c0_20 = arith.constant 0 : index
    %c0_21 = arith.constant 0 : index
    %34 = vector.load %arg3[%c0_20, %c0_21] : memref<64x64xf32, #tpu.memory_space<vmem>>, vector<64x64xf32>
    %cst_22 = arith.constant dense<0.000000e+00> : vector<32x64xf32>
    %35 = tpu.matmul %29, %34, %cst_22 {dimension_numbers = #tpu.dot_dimension_numbers<[1], [0], [0], [1], [0, 0, 1, 1], [], []>} : vector<32x64xf32>, vector<64x64xf32>, vector<32x64xf32> -> vector<32x64xf32>
    %c0_23 = arith.constant 0 : index
    %c0_24 = arith.constant 0 : index
    %36 = vector.load %arg4[%c0_23, %c0_24] : memref<64x128xf32, #tpu.memory_space<vmem>>, vector<64x128xf32>
    %cst_25 = arith.constant dense<0.000000e+00> : vector<32x128xf32>
    %37 = tpu.matmul %35, %36, %cst_25 {dimension_numbers = #tpu.dot_dimension_numbers<[1], [0], [0], [1], [0, 0, 1, 1], [], []>} : vector<32x64xf32>, vector<64x128xf32>, vector<32x128xf32> -> vector<32x128xf32>
    %c0_26 = arith.constant 0 : index
    %c0_27 = arith.constant 0 : index
    %38 = vector.load %arg5[%c0_26, %c0_27] : memref<1x128xf32, #tpu.memory_space<vmem>>, vector<1x128xf32>
    %39 = vector.broadcast %38 : vector<1x128xf32> to vector<32x128xf32>
    %40 = arith.addf %37, %39 : vector<32x128xf32>
    %41 = vector.extract_strided_slice %40 {offsets = [0, 0], sizes = [32, 32], strides = [1, 1]} : vector<32x128xf32> to vector<32x32xf32>
    %42 = vector.extract_strided_slice %40 {offsets = [0, 32], sizes = [32, 1], strides = [1, 1]} : vector<32x128xf32> to vector<32x1xf32>
    %43 = tpu.iota {dimensions = array<i32: 0>} : vector<32x1xi32>
    %cst_28 = arith.constant 0.000000e+00 : f32
    %44 = vector.broadcast %cst_28 : f32 to vector<32x1xf32>
    %45 = arith.maximumf %42, %44 : vector<32x1xf32>
    %c16_i32 = arith.constant 16 : i32
    %46 = vector.broadcast %c16_i32 : i32 to vector<32x1xi32>
    %47 = arith.cmpi slt, %43, %46 : vector<32x1xi32>
    %48 = arith.extui %47 : vector<32x1xi1> to vector<32x1xi32>
    %49 = arith.sitofp %48 : vector<32x1xi32> to vector<32x1xf32>
    %50 = arith.mulf %45, %49 : vector<32x1xf32>
    %cst_29 = arith.constant dense<0xFF800000> : vector<1xf32>
    %51 = vector.multi_reduction <maximumf>, %50, %cst_29 [0] : vector<32x1xf32> to vector<1xf32>
    %52 = vector.shape_cast %51 : vector<1xf32> to vector<1x1xf32>
    %53 = vector.broadcast %52 : vector<1x1xf32> to vector<32x1xf32>
    %54 = arith.cmpf oeq, %50, %53 : vector<32x1xf32>
    %c32_i32 = arith.constant 32 : i32
    %55 = vector.broadcast %c32_i32 : i32 to vector<32x1xi32>
    %56 = arith.select %54, %43, %55 : vector<32x1xi1>, vector<32x1xi32>
    %cst_30 = arith.constant dense<2147483647> : vector<1xi32>
    %57 = vector.multi_reduction <minsi>, %56, %cst_30 [0] : vector<32x1xi32> to vector<1xi32>
    %58 = vector.shape_cast %57 : vector<1xi32> to vector<1x1xi32>
    %59 = vector.broadcast %58 : vector<1x1xi32> to vector<32x1xi32>
    %60 = arith.cmpi eq, %43, %59 : vector<32x1xi32>
    %61 = arith.extui %60 : vector<32x1xi1> to vector<32x1xi32>
    %62 = arith.sitofp %61 : vector<32x1xi32> to vector<32x1xf32>
    %63 = vector.broadcast %62 : vector<32x1xf32> to vector<32x32xf32>
    %64 = arith.mulf %41, %63 : vector<32x32xf32>
    %cst_31 = arith.constant dense<0.000000e+00> : vector<32xf32>
    %65 = vector.multi_reduction <add>, %64, %cst_31 [0] : vector<32x32xf32> to vector<32xf32>
    %66 = vector.shape_cast %65 : vector<32xf32> to vector<1x32xf32>
    %67 = tpu.iota {dimensions = array<i32: 1>} : vector<1x32xi32>
    %68 = vector.broadcast %58 : vector<1x1xi32> to vector<1x32xi32>
    %69 = arith.cmpi eq, %67, %68 : vector<1x32xi32>
    %cst_32 = arith.constant 0.000000e+00 : f32
    %70 = vector.shape_cast %52 : vector<1x1xf32> to vector<1x1xf32>
    %71 = vector.broadcast %70 : vector<1x1xf32> to vector<1x32xf32>
    %72 = vector.broadcast %cst_32 : f32 to vector<1x32xf32>
    %73 = arith.select %69, %71, %72 : vector<1x32xi1>, vector<1x32xf32>
    %74 = tpu.concatenate %66, %73 in 1 : vector<1x32xf32>, vector<1x32xf32> -> vector<1x64xf32>
    %c0_33 = arith.constant 0 : index
    %c0_34 = arith.constant 0 : index
    %c0_35 = arith.constant 0 : index
    %75 = vector.load %arg7[%c0_33, %c0_34, %c0_35] : memref<1x1x64xf32, #tpu.memory_space<vmem>>, vector<1x1x64xf32>
    %76 = vector.shape_cast %75 : vector<1x1x64xf32> to vector<1x64xf32>
    %77 = vector.shape_cast %74 : vector<1x64xf32> to vector<1x1x64xf32>
    tpu.vector_store %arg7[%c0_33, %c0_34, %c0_35], %77 {strides = array<i32>} : memref<1x1x64xf32, #tpu.memory_space<vmem>>, vector<1x1x64xf32>,
    return
  }
  func.func @transform_0(%arg0: i32) -> (i32, i32, i32) {
    %c0_i32 = arith.constant 0 : i32
    %c0_i32_0 = arith.constant 0 : i32
    %c0_i32_1 = arith.constant 0 : i32
    return %arg0, %c0_i32, %c0_i32_0 : i32, i32, i32
  }
  func.func @transform_1(%arg0: i32) -> (i32, i32) {
    %c0_i32 = arith.constant 0 : i32
    %c0_i32_0 = arith.constant 0 : i32
    %c0_i32_1 = arith.constant 0 : i32
    return %c0_i32, %c0_i32_0 : i32, i32
  }
  func.func @transform_2(%arg0: i32) -> (i32, i32) {
    %c0_i32 = arith.constant 0 : i32
    %c0_i32_0 = arith.constant 0 : i32
    %c0_i32_1 = arith.constant 0 : i32
    return %c0_i32, %c0_i32_0 : i32, i32
  }
  func.func @transform_3(%arg0: i32) -> (i32, i32) {
    %c0_i32 = arith.constant 0 : i32
    %c0_i32_0 = arith.constant 0 : i32
    %c0_i32_1 = arith.constant 0 : i32
    return %c0_i32, %c0_i32_0 : i32, i32
  }
  func.func @transform_4(%arg0: i32) -> (i32, i32) {
    %c0_i32 = arith.constant 0 : i32
    %c0_i32_0 = arith.constant 0 : i32
    %c0_i32_1 = arith.constant 0 : i32
    return %c0_i32, %c0_i32_0 : i32, i32
  }
  func.func @transform_5(%arg0: i32) -> (i32, i32, i32) {
    %c0_i32 = arith.constant 0 : i32
    %c0_i32_0 = arith.constant 0 : i32
    %c0_i32_1 = arith.constant 0 : i32
    return %arg0, %c0_i32, %c0_i32_0 : i32, i32, i32
  }
  func.func @transform_6(%arg0: i32) -> (i32, i32, i32) {
    %c0_i32 = arith.constant 0 : i32
    %c0_i32_0 = arith.constant 0 : i32
    %c0_i32_1 = arith.constant 0 : i32
    return %arg0, %c0_i32, %c0_i32_0 : i32, i32, i32
  }
}

</mosaic_0001>

<bundles_post_ra>
// kernel: model_encode.1
= control target key start
LH: loop header
LB: loop body
LE: loop exit
PB: predicated region body
PF: predicated region fallthrough
CT: control target
= control target key end

     0   :  { %s1386_s21 = smov 0   ;;  %s1573_s0 = inlined_call_operand.vmem [shape: f32[2,40,32], index: 0, kind: input, shape index: {}]   ;;  %s1574_s1 = inlined_call_operand.vmem [shape: bf16[128,128], index: 1, kind: input, shape index: {}]   ;;  %s1575_s2 = inlined_call_operand.vmem [shape: f32[64,64], index: 2, kind: input, shape index: {}]   ;;  %s1576_s3 = inlined_call_operand.vmem [shape: f32[64,128], index: 3, kind: input, shape index: {}]   ;;  %s1577_s4 = inlined_call_operand.vmem [shape: f32[1,128], index: 4, kind: input, shape index: {}]   ;;  %s1578_s5 = inlined_call_operand.vmem [shape: f32[2,64,32], index: 5, kind: output, shape index: {0}]   ;;  %s1579_s6 = inlined_call_operand.vmem [shape: f32[2,1,64], index: 6, kind: output, shape index: {1}]  }
   0x1 LB: > { %s1103_s22 = sadd.s32 4294967295, %s1345_s21   ;;  %p1107_p0 = scmp.ge.s32.totalorder %s1345_s21, 1  ;;  %s1345_s21 = sphi %s1386_s21, %s17_s21  }
   0x2   : > { %p215_p1 = scmp.lt.s32.totalorder %s1345_s21, 3 }
   0x4   : > { %p216_p2 = pnand %p1107_p0, %p215_p1 }
   0x5   : > { %v1323_v0 = vld [vmem:[%s1574_s1 + $0x10] sm:$0xff] (!%p216_p2)   ;;  %p248_p3 = scmp.lt.s32.totalorder (!%p216_p2), %s1103_s22, 1  ;;  %v1324_v1 = vld [vmem:[%s1574_s1 + $0x18] sm:$0xff] (!%p216_p2)   ;;  %v1325_v2 = vld [vmem:[%s1574_s1] sm:$0xff] (!%p216_p2)   ;;  %vm294_vm0 = vcmask (!%p216_p2), 261120   ;;  %s1347_s13 = smov (!%p216_p2), 64  }
   0x6   : > { %219 = sbr.rel (%p216_p2) target bundleno = 1129 (0x469), region = 40  ;;  %1183 = vmatprep.subr.bf16.mxu0 (!%p216_p2), %v1323_v0  ;;  %v1326_v11 = vld [vmem:[%s1574_s1 + $0x8] sm:$0xff] (!%p216_p2)   ;;  %v1327_v13 = vld [vmem:[%s1574_s1 + $0x20] sm:$0xff] (!%p216_p2)   ;;  %v1329_v21 = vld [vmem:[%s1574_s1 + $0x30] sm:$0xff] (!%p216_p2)   ;;  %vm679_vm2 = vcmask (!%p216_p2), 523264   ;;  %vm914_vm10 = vcmask (!%p216_p2), 269568  }
   0x7   : > { %1184 = vmatpush3.bf16.msra.mxu0 (!%p216_p2), %v1323_v0  ;;  %v1328_v20 = vld [vmem:[%s1574_s1 + $0x28] sm:$0xff] (!%p216_p2)   ;;  %v1330_v28 = vld [vmem:[%s1574_s1 + $0x38] sm:$0xff] (!%p216_p2)   ;;  %v671_v32 = vld [vmem:[%s1575_s2] sm:$0xff] (!%p216_p2)  ;;  %s1350_s10 = smov (!%p216_p2), 32  }
   0x8   : > { %1185 = vmatprep.subr.bf16.mxu0 (!%p216_p2), %v1324_v1  ;;  %v672_v33 = vld [vmem:[%s1575_s2 + $0x8] sm:$0xff] (!%p216_p2)  ;;  %v673_v35 = vld [vmem:[%s1575_s2 + $0x10] sm:$0xff] (!%p216_p2)  ;;  %v674_v36 = vld [vmem:[%s1575_s2 + $0x18] sm:$0xff] (!%p216_p2) }
   0x9   : > { %v1259_v34 = vpack.c.bf16 (!%p216_p2), %v672_v33, %v671_v32  ;;  %v675_v37 = vld [vmem:[%s1575_s2 + $0x20] sm:$0xff] (!%p216_p2)  ;;  %v1263_v38 = vpack.c.bf16 (!%p216_p2), %v674_v36, %v673_v35  ;;  %v676_v39 = vld [vmem:[%s1575_s2 + $0x28] sm:$0xff] (!%p216_p2)  ;;  %v677_v41 = vld [vmem:[%s1575_s2 + $0x30] sm:$0xff] (!%p216_p2)  ;;  %v1348_v32 = vmov (!%p216_p2), 32  }
   0xa   : > { %v1267_v40 = vpack.c.bf16 (!%p216_p2), %v676_v39, %v675_v37  ;;  %v678_v42 = vld [vmem:[%s1575_s2 + $0x38] sm:$0xff] (!%p216_p2)  ;;  %v777_v52 = vld [vmem:[%s1576_s3] sm:$0xff] (!%p216_p2)  ;;  %v778_v53 = vld [vmem:[%s1576_s3 + $0x8] sm:$0xff] (!%p216_p2)  ;;  %1317 = vset.pattern.permute.xlu1 (!%p216_p2), %v1348_v32  ;;  %1316 = vset.pattern.permute.xlu0 (!%p216_p2), %v1348_v32 }
   0xb   : > { %1186 = vmatpush3.bf16.msra.mxu0 (!%p216_p2), %v1324_v1  ;;  %1260 = vmatprep.subr.bf16.mxu1 (!%p216_p2), %v1259_v34  ;;  %v1271_v48 = vpack.c.bf16 (!%p216_p2), %v678_v42, %v677_v41  ;;  %v1275_v54 = vpack.c.bf16 (!%p216_p2), %v778_v53, %v777_v52  ;;  %v1131_v33 = vld [vmem:[%s1577_s4] ss:$0 sm:$0xff] (!%p216_p2) }
   0xc   : > { %1191 = vmatprep.subr.bf16.mxu0 (!%p216_p2), %v1325_v2  ;;  %1262 = vmatpush3.bf16.msra.mxu1 (!%p216_p2), %v1259_v34 }
   0xd   : > { %s1581_s22 = smov (!%p248_p3, %s1103_s22), 1  ;;  %1264 = vmatprep.subr.bf16.mxu1 %v1263_v38 }
   0xe   : > { %s1303_s27 = smul.u32 40, %s1581_s22  ;;  %s1142_s11 = sshll.u32 %s1581_s22, 6 }
   0xf   : > { %s257_s14 = scalar_lea.vmem %s1578_s5, %s1142_s11  ;;  %s260_s17 = scalar_lea.vmem %s1579_s6, %s1581_s22 }
  0x10   : > { %s1409_s8 = scalar_lea.vmem %s1573_s0, %s1303_s27  ;;  %1266 = vmatpush3.bf16.msra.mxu1 %v1263_v38 }
  0x11   : > { %v272_v3 = vld [vmem:[%s1409_s8 + $0x1] sm:$0xff]  ;;  %v273_v4 = vld [vmem:[%s1409_s8 + $0x9] sm:$0xff]  ;;  %v274_v5 = vld [vmem:[%s1409_s8 + $0x11] sm:$0xff]  ;;  %1268 = vmatprep.subr.bf16.mxu1 %v1267_v40 }
  0x12   : > { %v276_v6 = vpack.c.bf16 %v273_v4, %v272_v3  ;;  %v275_v7 = vld [vmem:[%s1409_s8 + $0x19] sm:$0xff]  ;;  %v263_v9 = vld [vmem:[%s1409_s8 + $0x8] sm:$0xff]  ;;  %v264_v14 = vld [vmem:[%s1409_s8 + $0x10] sm:$0xff] }
  0x13   : > { %v262_v8 = vld [vmem:[%s1409_s8] sm:$0xff]  ;;  %v277_v10 = vpack.c.bf16 %v275_v7, %v274_v5  ;;  %v265_v15 = vld [vmem:[%s1409_s8 + $0x18] sm:$0xff]  ;;  %v418_v17 = vld [vmem:[%s1409_s8 + $0xa] sm:$0xff] }
  0x14   : > { %v266_v12 = vpack.c.bf16 %v263_v9, %v262_v8  ;;  %1187 = vmatprep.mubr.msk.bf16.mxu0 %vm294_vm0, %v276_v6  ;;  %v417_v16 = vld [vmem:[%s1409_s8 + $0x2] sm:$0xff]  ;;  %v267_v18 = vpack.c.bf16 %v265_v15, %v264_v14  ;;  %v419_v22 = vld [vmem:[%s1409_s8 + $0x12] sm:$0xff]  ;;  %v420_v23 = vld [vmem:[%s1409_s8 + $0x1a] sm:$0xff]  ;;  %1270 = vmatpush3.bf16.msra.mxu1 %v1267_v40 }
  0x15   : > { %1188 = vmatmul.mubr.msk.bf16.vlgmr.msra.gmra.mrb[0].mxu0 %vm294_vm0, %v277_v10  ;;  %v421_v19 = vpack.c.bf16 %v418_v17, %v417_v16  ;;  %v498_v24 = vld [vmem:[%s1409_s8 + $0x3] sm:$0xff]  ;;  %v499_v25 = vld [vmem:[%s1409_s8 + $0xb] sm:$0xff]  ;;  %v422_v26 = vpack.c.bf16 %v420_v23, %v419_v22  ;;  %v500_v29 = vld [vmem:[%s1409_s8 + $0x13] sm:$0xff]  ;;  %1272 = vmatprep.subr.bf16.mxu1 %v1271_v48 }
  0x16   : > { %1192 = vmatpush3.bf16.msra.mxu0 %v1325_v2  ;;  %1195 = vmatprep.mubr.msk.bf16.mxu0 %vm294_vm0, %v266_v12  ;;  %v502_v27 = vpack.c.bf16 %v499_v25, %v498_v24  ;;  %v501_v30 = vld [vmem:[%s1409_s8 + $0x1b] sm:$0xff]  ;;  %v779_v8 = vld [vmem:[%s1576_s3 + $0x10] sm:$0xff] }
  0x17   : > { %1193 = vmatprep.subr.bf16.mxu0 %v1326_v11  ;;  %v503_v31 = vpack.c.bf16 %v501_v30, %v500_v29  ;;  %v780_v9 = vld [vmem:[%s1576_s3 + $0x18] sm:$0xff]  ;;  %v783_v25 = vld [vmem:[%s1576_s3 + $0x30] sm:$0xff] }
  0x18   : > { %1274 = vmatpush3.bf16.msra.mxu1 %v1271_v48  ;;  %v1279_v16 = vpack.c.bf16 %v780_v9, %v779_v8 }
  0x19   : > { %1276 = vmatprep.subr.bf16.mxu1 %v1275_v54 }
  0x1a   : > { %1194 = vmatpush3.bf16.msra.mxu0 %v1326_v11 }
  0x1b   : > { %1199 = vmatprep.subr.bf16.mxu0 %v1327_v13 }
  0x21   : > { %1196 = vmatmul.mubr.msk.bf16.vlgmr.msra.gmra.mrb[0].mxu0 %vm294_vm0, %v267_v18  ;;  %v781_v18 = vld [vmem:[%s1576_s3 + $0x20] sm:$0xff] }
  0x22   : > { %1200 = vmatpush3.bf16.msra.mxu0 %v1327_v13  ;;  %1203 = vmatprep.mubr.msk.bf16.mxu0 %vm294_vm0, %v421_v19  ;;  %v782_v19 = vld [vmem:[%s1576_s3 + $0x28] sm:$0xff] }
  0x23   : > { %1201 = vmatprep.subr.bf16.mxu0 %v1328_v20  ;;  %v1283_v23 = vpack.c.bf16 %v782_v19, %v781_v18 }
  0x26   : > { %1202 = vmatpush3.bf16.msra.mxu0 %v1328_v20 }
  0x27   : > { %1207 = vmatprep.subr.bf16.mxu0 %v1329_v21 }
  0x2d   : > { %1204 = vmatmul.mubr.msk.bf16.vlgmr.msra.gmra.mrb[0].mxu0 %vm294_vm0, %v422_v26  ;;  %v784_v26 = vld [vmem:[%s1576_s3 + $0x38] sm:$0xff] }
  0x2e   : > { %1208 = vmatpush3.bf16.msra.mxu0 %v1329_v21  ;;  %1211 = vmatprep.mubr.msk.bf16.mxu0 %vm294_vm0, %v502_v27  ;;  %v1287_v27 = vpack.c.bf16 %v784_v26, %v783_v25 }
  0x2f   : > { %1209 = vmatprep.subr.bf16.mxu0 %v1330_v28 }
  0x32   : > { %1210 = vmatpush3.bf16.msra.mxu0 %v1330_v28 }
  0x39   : > { %1212 = vmatmul.mubr.msk.bf16.vlgmr.msra.gmra.mrb[0].mxu0 %vm294_vm0, %v503_v31 }
 0x10c   : > { %v1213_v43 = vpop.f32.mrb[0].mxu0 }
 0x10d   : > { %v581_v44 = vmul.f32 %v1213_v43, %v1213_v43  ;;  %v560_v45 = vpop.f32.mrb[1].mxu0 }
 0x10e   : > { %v579_v46 = vmul.f32 %v560_v45, %v560_v45  ;;  %v1214_v47 = vpop.f32.mrb[2].mxu0 }
 0x10f   : > { %591 = vrot.lane.b32.xlu1 %v581_v44, %s1347_s13  ;;  %v563_v49 = vpop.f32.mrb[3].mxu0  ;;  %v582_v50 = vmul.f32 %v1214_v47, %v1214_v47 }
 0x110   : > { %587 = vrot.lane.b32.xlu0 %v579_v46, %s1347_s13  ;;  %v580_v51 = vmul.f32 %v563_v49, %v563_v49 }
 0x113   : > { %593 = vrot.lane.b32.xlu1 %v582_v50, %s1347_s13 }
 0x114   : > { %589 = vrot.lane.b32.xlu0 %v580_v51, %s1347_s13 }
 0x181   : > { %v592_v55 = vpop.permute.xlu1 %591 }
 0x182   : > { %v601_v56 = vadd.f32 %v592_v55, %v581_v44  ;;  %v588_v57 = vpop.permute.xlu0 %587 }
 0x183   : > { %v599_v58 = vadd.f32 %v588_v57, %v579_v46 }
 0x184   : > { %1331 = vrsqrt.f32 %v601_v56  ;;  %vm619_vm4 = vcmp.eq.f32.partialorder %v601_v56, inf  ;;  %v622_v15 = vand.u32 2147483648, %v601_v56  ;;  %vm621_vm7 = vcmp.eq.f32.partialorder %v601_v56, 0.0 }
 0x185   : > { %v594_v59 = vpop.permute.xlu1 %593  ;;  %1333 = vrsqrt.f32 %v599_v58  ;;  %vm605_vm1 = vcmp.eq.f32.partialorder %v599_v58, inf  ;;  %v608_v2 = vand.u32 2147483648, %v599_v58  ;;  %vm607_vm3 = vcmp.eq.f32.partialorder %v599_v58, 0.0 }
 0x186   : > { %v602_v60 = vadd.f32 %v594_v59, %v582_v50  ;;  %v590_v61 = vpop.permute.xlu0 %589 }
 0x187   : > { %v600_v62 = vadd.f32 %v590_v61, %v580_v51 }
 0x188   : > { %1335 = vrsqrt.f32 %v602_v60  ;;  %vm626_vm8 = vcmp.eq.f32.partialorder %v602_v60, inf  ;;  %v629_v22 = vand.u32 2147483648, %v602_v60  ;;  %vm628_vm9 = vcmp.eq.f32.partialorder %v602_v60, 0.0 }
 0x189   : > { %1337 = vrsqrt.f32 %v600_v62  ;;  %vm612_vm5 = vcmp.eq.f32.partialorder %v600_v62, inf  ;;  %v615_v12 = vand.u32 2147483648, %v600_v62  ;;  %vm614_vm6 = vcmp.eq.f32.partialorder %v600_v62, 0.0 }
 0x18e   : > { %v1332_v63 = vpop.eup %1331 }
 0x18f   : > { %v1334_v0 = vpop.eup %1333  ;;  %v618_v3 = vmul.f32 %v1332_v63, %v601_v56 }
 0x190   : > { %v604_v1 = vmul.f32 %v1334_v0, %v599_v58 }
 0x191   : > { %v620_v13 = vsel %vm619_vm4, %v601_v56, %v618_v3  ;;  %v889_v56 = vlaneseq }
 0x192   : > { %v1336_v4 = vpop.eup %1335  ;;  %v606_v5 = vsel %vm605_vm1, %v599_v58, %v604_v1  ;;  %v1500_v20 = vsel %vm621_vm7, %v622_v15, %v620_v13 }
 0x193   : > { %v1338_v6 = vpop.eup %1337  ;;  %v1480_v7 = vsel %vm607_vm3, %v608_v2, %v606_v5  ;;  %v625_v11 = vmul.f32 %v1336_v4, %v602_v60  ;;  %v890_v59 = vshrl.u32 %v889_v56, 7 }
 0x194   : > { %1231 = vmatprep.mubr.msk.f32.mxu1 %vm679_vm2, %v1480_v7  ;;  %v611_v10 = vmul.f32 %v1338_v6, %v600_v62 }
 0x195   : > { %v627_v21 = vsel %vm626_vm8, %v602_v60, %v625_v11  ;;  %v892_v63 = vadd.s32 16, %v890_v59  ;;  %v893_v0 = vadd.s32 24, %v890_v59 }
 0x196   : > { %v613_v14 = vsel %vm612_vm5, %v600_v62, %v611_v10  ;;  %v1504_v24 = vsel %vm628_vm9, %v629_v22, %v627_v21  ;;  %v891_v62 = vadd.s32 8, %v890_v59  ;;  %v1349_v22 = vmov 0.0  }
 0x197   : > { %v1490_v17 = vsel %vm614_vm6, %v615_v12, %v613_v14 }
 0x198   : > { %1232 = vmatmul.mubr.msk.f32.vlgmr.msra.gmra.mrb[0].mxu1 %vm679_vm2, %v1490_v17 }
 0x199   : > { %1234 = vmatprep.mubr.msk.f32.mxu1 %vm679_vm2, %v1500_v20  ;;  %1278 = vmatpush3.bf16.msra.mxu1 %v1275_v54 }
 0x19a   : > { %1280 = vmatprep.subr.bf16.mxu1 %v1279_v16 }
 0x19c   : > { %1235 = vmatmul.mubr.msk.f32.gmra.mrb[2].mxu1 %vm679_vm2, %v1504_v24 }
 0x19d   : > { %1282 = vmatpush3.bf16.msra.mxu1 %v1279_v16 }
 0x19e   : > { %1284 = vmatprep.subr.bf16.mxu1 %v1283_v23 }
 0x1a1   : > { %1286 = vmatpush3.bf16.msra.mxu1 %v1283_v23 }
 0x1a2   : > { %1288 = vmatprep.subr.bf16.mxu1 %v1287_v27 }
 0x1a5   : > { %1290 = vmatpush3.bf16.msra.mxu1 %v1287_v27 }
 0x26b   : > { %v1233_v28 = vpop.f32.mrb[0].mxu1 }
 0x26c   : > { %v758_v29 = vpop.f32.mrb[1].mxu1 }
 0x26d   : > { %1253 = vmatprep.mubr.msk.f32.mxu1 %vm679_vm2, %v758_v29  ;;  %v1005_v29 = vand.u32 127, %v889_v56 }
 0x26e   : > { %1254 = vmatmul.mubr.msk.f32.vlgmr.msra.gmra.mrb[4].mxu1 %vm679_vm2, %v1233_v28 }
 0x26f   : > { %v1236_v30 = vpop.f32.mrb[2].mxu1 }
 0x270   : > { %v768_v31 = vpop.f32.mrb[3].mxu1 }
 0x271   : > { %1256 = vmatprep.mubr.msk.f32.mxu1 %vm679_vm2, %v768_v31 }
 0x272   : > { %1257 = vmatmul.mubr.msk.f32.gmra.mrb[6].mxu1 %vm679_vm2, %v1236_v30 }
 0x341   : > { %v1255_v34 = vpop.f32.mrb[4].mxu1 }
 0x342   : > { %v870_v35 = vpop.f32.mrb[5].mxu1  ;;  %v1521_v36 = vadd.f32 %v1255_v34, %v1131_v33 }
 0x343   : > { %v1523_v37 = vadd.f32 %v1131_v33, %v870_v35 }
 0x344   : > { %v895_v41 = vmax.f32 %v1521_v36, 0.0 }
 0x345   : > { %v1258_v38 = vpop.f32.mrb[6].mxu1  ;;  %v894_v42 = vmax.f32 %v1523_v37, 0.0 }
 0x346   : > { %v1525_v39 = vadd.f32 %v1258_v38, %v1131_v33  ;;  %v880_v40 = vpop.f32.mrb[7].mxu1  ;;  %v916_v47 = vsel %vm914_vm10, %v895_v41, -inf }
 0x347   : > { %v1529_v43 = vadd.f32 %v1131_v33, %v880_v40  ;;  %v915_v48 = vsel %vm914_vm10, %v894_v42, -inf }
 0x348   : > { %v897_v44 = vmax.f32 %v1525_v39, 0.0  ;;  %v919_v52 = vmax.f32 %v915_v48, %v916_v47 }
 0x349   : > { %v896_v45 = vmax.f32 %v1529_v43, 0.0 }
 0x34a   : > { %v913_v46 = vmul.f32 0.0, %v897_v44 }
 0x34b   : > { %v912_v49 = vmul.f32 0.0, %v896_v45 }
 0x34c   : > { %v918_v50 = vsel %vm914_vm10, %v913_v46, -inf }
 0x34d   : > { %v917_v51 = vsel %vm914_vm10, %v912_v49, -inf }
 0x34e   : > { %v920_v53 = vmax.f32 %v917_v51, %v918_v50 }
 0x350   : > { %v921_v54 = vmax.f32 %v919_v52, %v920_v53 }
 0x352   : > { %v922_v55 = vrot.slane %v921_v54, 4 }
 0x354   : > { %v923_v57 = vmax.f32 %v921_v54, %v922_v55 }
 0x356   : > { %v924_v58 = vrot.slane %v923_v57, 2 }
 0x358   : > { %v925_v60 = vmax.f32 %v923_v57, %v924_v58 }
 0x35a   : > { %v926_v61 = vrot.slane %v925_v60, 1 }
 0x35c   : > { %v927_v1 = vmax.f32 %v925_v60, %v926_v61 }
 0x35e   : > { %vm928_vm11 = vcmp.eq.f32.partialorder %v894_v42, %v927_v1  ;;  %vm929_vm12 = vcmp.eq.f32.partialorder %v895_v41, %v927_v1  ;;  %vm930_vm13 = vcmp.eq.f32.partialorder %v912_v49, %v927_v1  ;;  %vm931_vm14 = vcmp.eq.f32.partialorder %v913_v46, %v927_v1  ;;  %1012 = vperm.xlu1 %1317, %v927_v1  }
 0x35f   : > { %v932_v2 = vsel %vm928_vm11, %v890_v59, 32  ;;  %v933_v3 = vsel %vm929_vm12, %v891_v62, 32  ;;  %v934_v4 = vsel %vm930_vm13, %v892_v63, 32  ;;  %v935_v5 = vsel %vm931_vm14, %v893_v0, 32 }
 0x360   : > { %v936_v6 = vsel %vm914_vm10, %v932_v2, 2147483647  ;;  %v937_v8 = vsel %vm914_vm10, %v933_v3, 2147483647  ;;  %v938_v9 = vsel %vm914_vm10, %v934_v4, 2147483647 }
 0x361   : > { %v939_v10 = vsel %vm914_vm10, %v935_v5, 2147483647  ;;  %vm940_vm15 = vcmp.lt.s32.totalorder %v936_v6, %v937_v8  ;;  %vm1021_vm11 = vcmask 516096  }
 0x362   : > { %v941_v11 = vsel %vm940_vm15, %v936_v6, %v937_v8  ;;  %vm942_vm1 = vcmp.lt.s32.totalorder %v938_v9, %v939_v10 }
 0x363   : > { %v943_v12 = vsel %vm942_vm1, %v938_v9, %v939_v10 }
 0x364   : > { %vm944_vm2 = vcmp.lt.s32.totalorder %v941_v11, %v943_v12 }
 0x365   : > { %v945_v13 = vsel %vm944_vm2, %v941_v11, %v943_v12 }
 0x366   : > { %v946_v14 = vrot.slane %v945_v13, 4 }
 0x368   : > { %vm947_vm3 = vcmp.lt.s32.totalorder %v945_v13, %v946_v14 }
 0x369   : > { %v948_v15 = vsel %vm947_vm3, %v945_v13, %v946_v14 }
 0x36a   : > { %v949_v16 = vrot.slane %v948_v15, 2 }
 0x36c   : > { %vm950_vm4 = vcmp.lt.s32.totalorder %v948_v15, %v949_v16 }
 0x36d   : > { %v951_v18 = vsel %vm950_vm4, %v948_v15, %v949_v16 }
 0x36e   : > { %v952_v19 = vrot.slane %v951_v18, 1 }
 0x370   : > { %vm953_vm5 = vcmp.lt.s32.totalorder %v951_v18, %v952_v19 }
 0x371   : > { %v954_v21 = vsel %vm953_vm5, %v951_v18, %v952_v19 }
 0x372   : > { %1007 = vperm.xlu0 %1316, %v954_v21   ;;  %vm957_vm6 = vcmp.eq.s32.totalorder %v892_v63, %v954_v21  ;;  %vm955_vm7 = vcmp.eq.s32.totalorder %v890_v59, %v954_v21  ;;  %vm956_vm8 = vcmp.eq.s32.totalorder %v891_v62, %v954_v21  ;;  %vm958_vm9 = vcmp.eq.s32.totalorder %v893_v0, %v954_v21 }
 0x373   : > { %v1136_v23 = vsel %vm955_vm7, 1.0, %v1349_v22  ;;  %v1137_v25 = vsel %vm956_vm8, 1.0, %v1349_v22  ;;  %v1138_v27 = vsel %vm957_vm6, 1.0, %v1349_v22  ;;  %v1139_v28 = vsel %vm958_vm9, 1.0, %v1349_v22 }
 0x374   : > { %v1318_v26 = vpack.i.bf16 %v1137_v25, %v1136_v23 }
 0x376   : > { %979 = vperm.xlu0 %1316, %v1138_v27   ;;  %1319 = vperm.xlu1 %1317, %v1318_v26  }
 0x37a   : > { %984 = vperm.xlu1 %1317, %v1139_v28  }
 0x3a3   : > { %631 = vxpose.xlu1.b32.start [1/4] (short) (narrow) %v1480_v7, 64 }
 0x3a7   : > { %632 = vxpose.xlu1.b32.cont [2/4] (short) (narrow) %v1490_v17, 64 }
 0x3ab   : > { %633 = vxpose.xlu1.b32.cont [3/4] (short) (narrow) %v1500_v20, 64 }
 0x3af   : > { %634 = vxpose.xlu1.b32.end [4/4] (short) (narrow) %v1504_v24, 64 }
 0x3dd   : > { %v1013_v31 = vpop.permute.xlu1 %1012 }
 0x3f1   : > { %v1008_v30 = vpop.permute.xlu0 %1007 }
 0x3f2   : > { %vm1009_vm10 = vcmp.eq.s32.totalorder %v1005_v29, %v1008_v30 }
 0x3f3   : > { %v1015_v32 = vsel %vm1009_vm10, %v1013_v31, 0.0 }
 0x3f4   : > { %1017 = vrot.lane.b32.xlu0 %v1015_v32, %s1350_s10 }
 0x3f5   : > { %v1320_v33 = vpop.permute.xlu1 %1319  ;;  %v980_v47 = vpop.permute.xlu0 %979 }
 0x3f6   : > { %v1322_v40 = vunpack.i.h.bf16 %v1320_v33  ;;  %v1321_v41 = vunpack.i.l.bf16 %v1320_v33  ;;  %v989_v50 = vmul.f32 %v980_v47, %v1529_v43 }
 0x3f8   : > { %v988_v44 = vmul.f32 %v1322_v40, %v1521_v36  ;;  %v987_v45 = vmul.f32 %v1321_v41, %v1523_v37  ;;  %v994_v52 = vsel %vm294_vm0, %v989_v50, 0.0 }
 0x3f9   : > { %v985_v34 = vpop.permute.xlu1 %984 }
 0x3fa   : > { %v992_v48 = vsel %vm294_vm0, %v988_v44, 0.0  ;;  %v991_v49 = vsel %vm294_vm0, %v987_v45, 0.0  ;;  %v990_v53 = vmul.f32 %v985_v34, %v1525_v39 }
 0x3fb   : > { %v993_v51 = vadd.f32 %v992_v48, %v991_v49 }
 0x3fc   : > { %v996_v36 = vsel %vm294_vm0, %v990_v53, 0.0 }
 0x3fd   : > { %v995_v54 = vadd.f32 %v994_v52, %v993_v51 }
 0x3ff   : > { %v997_v37 = vadd.f32 %v996_v36, %v995_v54 }
 0x401   : > { %v998_v55 = vrot.slane %v997_v37, 4 }
 0x403   : > { %v999_v56 = vadd.f32 %v998_v55, %v997_v37 }
 0x405   : > { %v1000_v57 = vrot.slane %v999_v56, 2 }
 0x407   : > { %v1001_v58 = vadd.f32 %v1000_v57, %v999_v56 }
 0x409   : > { %v1002_v59 = vrot.slane %v1001_v58, 1 }
 0x40b   : > { %v1003_v43 = vadd.f32 %v1002_v59, %v1001_v58 }
 0x423   : > { %v647_v7 = vpop.trf.xlu1 }
 0x424   : > { %663 = vst.msk [vmem:[%s257_s14] sm:$0xff] %vm294_vm0, %v647_v7 }
 0x427   : > { %v648_v17 = vpop.trf.xlu1 }
 0x428   : > { %664 = vst.msk [vmem:[%s257_s14 + $0x8] sm:$0xff] %vm294_vm0, %v648_v17 }
 0x42b   : > { %v649_v20 = vpop.trf.xlu1 }
 0x42c   : > { %665 = vst.msk [vmem:[%s257_s14 + $0x10] sm:$0xff] %vm294_vm0, %v649_v20 }
 0x42f   : > { %v650_v24 = vpop.trf.xlu1 }
 0x430   : > { %666 = vst.msk [vmem:[%s257_s14 + $0x18] sm:$0xff] %vm294_vm0, %v650_v24 }
 0x433   : > { %v651_v35 = vpop.trf.xlu1 }
 0x434   : > { %667 = vst.msk [vmem:[%s257_s14 + $0x20] sm:$0xff] %vm294_vm0, %v651_v35 }
 0x437   : > { %v652_v38 = vpop.trf.xlu1 }
 0x438   : > { %668 = vst.msk [vmem:[%s257_s14 + $0x28] sm:$0xff] %vm294_vm0, %v652_v38 }
 0x43b   : > { %v653_v42 = vpop.trf.xlu1 }
 0x43c   : > { %669 = vst.msk [vmem:[%s257_s14 + $0x30] sm:$0xff] %vm294_vm0, %v653_v42 }
 0x43f   : > { %v654_v46 = vpop.trf.xlu1 }
 0x440   : > { %670 = vst.msk [vmem:[%s257_s14 + $0x38] sm:$0xff] %vm294_vm0, %v654_v46 }
 0x466   : > { %v1018_v60 = vpop.permute.xlu0 %1017 }
 0x467   : > { %v1020_v61 = vsel %vm294_vm0, %v1003_v43, %v1018_v60 }
 0x468   : > { %1022 = vst.msk [vmem:[%s260_s17] sm:$0x1] %vm1021_vm11, %v1020_v61 }
 0x469 PF: > { %s17_s21 = sadd.s32 1, %s1345_s21  }
 0x46a   : > { %p14_p4 = scmp.ge.s32.totalorder %s17_s21, 4  }
 0x46c   :  { %16 = sbr.rel (!%p14_p4) target bundleno = 1 (0x1), region = 82 }

</bundles_post_ra>
